<compile_context>
chip_gen: v7x
topology: tpu7x:2x2x1
jax: 0.10.0
libtpu: 0.0.40
codegen_flags: <defaults>
</compile_context>

<pallas_src>
import functools

import jax
import jax.numpy as jnp
from jax.experimental import pallas as pl
from jax.experimental.pallas import tpu as pltpu

NUM_CLASS = 5
GAMMA = 2.0
ALPHA_LIST = (0.1825, 0.15, 0.235, 0.2375, 0.195)

# Rows of 128 pixels per grid step (cap).  1024 rows = 131072 pixels:
# f32 logits block = C*1024*128*4 B = 2.5 MiB (x2 double-buffered), plus a few MiB of
# elementwise temporaries -> comfortably inside the 32 MiB scoped VMEM default on every
# generation (v5e/v6e 128 MiB physical, v7x 64 MiB), no vmem_limit_bytes override needed.
_S_TILE_CAP = 1024


def _choose_s_tile(s):
    """Pick rows-of-128 per block.  Prefer a divisor of `s` so the logits never need an
    HBM padding pass; tiled (non-full) blocks keep the sublane dim 32-aligned so the f32
    logits and int8 targets both get clean layouts."""
    if s <= _S_TILE_CAP:
        return s                      # single block == full array dim (any size is fine)
    best = 0
    for d in range(32, _S_TILE_CAP + 1, 32):
        if s % d == 0:
            best = d
    if best >= _S_TILE_CAP // 4:
        return best                   # good divisor found -> zero padding
    return _S_TILE_CAP                # fall back: pad the S axis up to a multiple


def _focal_loss_kernel(x_ref, tgt_ref, out_a_ref, out_fl_ref, acc_a, acc_fl,
                       *, gamma, alpha, needs_mask):
    # x_ref   : [C, S, 128]  logits block (pixels dense on sublanes x lanes)
    # tgt_ref : [S, 128]     int8 targets (-1 marks padded pixels)
    # out_*   : [1, 1]       per-(batch, part) scalar outputs (written in epilogue only)
    # acc_*   : [S, 128]     f32 VMEM scratch accumulators, live across the t axis
    num_class = x_ref.shape[0]
    t = pl.program_id(2)

    @pl.when(t == 0)
    def _init():
        acc_a[...] = jnp.zeros_like(acc_a)
        acc_fl[...] = jnp.zeros_like(acc_fl)

    tgt = tgt_ref[...].astype(jnp.int32)                         # [S, 128]

    # bf16 inputs keep the subtract/exp on the bf16 VPU/EUP path (v6e/v7x);
    # everything else computes in f32.  All accumulation is f32.
    cdt = jnp.bfloat16 if x_ref.dtype == jnp.bfloat16 else jnp.float32

    # Running max over the (unrolled) class axis: pure elementwise VPU max over full
    # [S,128] slabs -- no cross-sublane XLU reduce.  Class slabs are re-loaded from the
    # VMEM block below instead of being kept live (loads are cheap; live slabs spill).
    x_max = x_ref[0].astype(cdt)
    for c in range(1, num_class):
        x_max = jnp.maximum(x_max, x_ref[c].astype(cdt))

    # One exp per class; the same boolean mask selects the target-class exp, the
    # target-class (x - x_max) and the (compile-time constant) alpha weight.
    denom = None        # sum_c exp(x_c - x_max)                  (f32)
    exp_t = None        # exp(x_t - x_max)                        (f32)
    d_t = None          # x_t - x_max                             (f32)
    alpha_sel = None    # alpha[target]                           (f32)
    for c in range(num_class):
        d_c = x_ref[c].astype(cdt) - x_max
        e_c = jnp.exp(d_c)                                       # EUP, once per class
        e32 = e_c.astype(jnp.float32)
        is_c = tgt == c                                          # padded tgt=-1 -> False
        d32 = d_c.astype(jnp.float32)
        if c == 0:
            denom = e32
            exp_t = jnp.where(is_c, e32, 0.0)
            d_t = jnp.where(is_c, d32, 0.0)
            alpha_sel = jnp.where(is_c, alpha[0], 0.0)
        else:
            denom = denom + e32
            exp_t = jnp.where(is_c, e32, exp_t)
            d_t = jnp.where(is_c, d32, d_t)
            alpha_sel = jnp.where(is_c, alpha[c], alpha_sel)

    # logpt: exact log-softmax at the target class (no eps, no NaN);
    # pt: reuse the already-computed exp via an approximate EUP reciprocal
    # instead of a second exp.
    logpt = d_t - jnp.log(denom)                                 # <= 0
    pt = exp_t * pl.reciprocal(denom, approx=True)
    one_m_pt = 1.0 - pt
    if gamma == 2.0:
        focal_w = one_m_pt * one_m_pt                            # exact, no pow
    elif gamma == 1.0:
        focal_w = one_m_pt
    elif gamma == 0.0:
        focal_w = jnp.ones_like(one_m_pt)
    else:
        # clamp: the approx reciprocal can push pt a hair past 1.0
        focal_w = jnp.power(jnp.maximum(one_m_pt, 0.0), jnp.float32(gamma))
    fl = focal_w * logpt

    if needs_mask:
        # Padded pixels carry target == -1: they selected nothing above
        # (alpha_sel == 0 already), only fl needs an explicit mask.
        fl = jnp.where(tgt >= 0, fl, 0.0)

    acc_a[...] += alpha_sel
    acc_fl[...] += fl

    # Cross-lane/sublane reduction + (1,1) store only once per (batch, part).
    @pl.when(t == pl.num_programs(2) - 1)
    def _store():
        out_a_ref[...] = jnp.sum(acc_a[...], keepdims=True)
        out_fl_ref[...] = jnp.sum(acc_fl[...], keepdims=True)


def focal_loss(x, target, alpha=ALPHA_LIST, *, gamma=GAMMA, size_average=True):
    """x: [N, C, H, W] logits (NCHW, as in the PyTorch module); target: [N, H, W]
    integer class ids; alpha: python sequence of C class weights (normalized here,
    exactly as FocalLoss.__init__ does for a list alpha)."""
    # TODO(synk): the `smooth` label-smoothing option (default None) is not implemented.
    n, c, h, w = x.shape
    hw = h * w
    m = n * hw

    a = [float(v) for v in alpha]
    assert len(a) == c, "alpha length must equal the number of classes"
    a_sum = sum(a)
    alpha_n = tuple(v / a_sum for v in a)          # compile-time constants

    s = pl.cdiv(hw, 128)
    s_tile = _choose_s_tile(s)
    n_tiles = pl.cdiv(s, s_tile)
    hw_pad = n_tiles * s_tile * 128
    needs_mask = hw_pad != hw

    # Free reshapes: classes stay on a leading axis, pixels are re-laid out onto
    # (sublanes x lanes) so every vreg is fully occupied.
    x3 = x.reshape(n, c, hw)
    tgt2 = target.reshape(n, hw).astype(jnp.int8)  # 4x less target HBM traffic
    if needs_mask:
        # Ragged hw: pad once (zeros for logits, -1 for targets); padded pixels
        # contribute exactly zero.  Avoided entirely whenever 128*s_tile divides hw,
        # which the tile chooser aims for.
        x3 = jnp.pad(x3, ((0, 0), (0, 0), (0, hw_pad - hw)))
        tgt2 = jnp.pad(tgt2, ((0, 0), (0, hw_pad - hw)), constant_values=-1)
    x4 = x3.reshape(n, c, n_tiles * s_tile, 128)
    tgt3 = tgt2.reshape(n, n_tiles * s_tile, 128)

    # Megacore: also split the spatial-tile axis in two when possible so both v7x
    # TensorCores get work even at N == 1 (harmless no-op on single-TC v5e/v6e).
    p_split = 2 if (n_tiles % 2 == 0) else 1
    tiles_per_part = n_tiles // p_split

    kernel = functools.partial(_focal_loss_kernel, gamma=float(gamma),
                               alpha=alpha_n, needs_mask=needs_mask)

    sum_a, sum_fl = pl.pallas_call(
        kernel,
        grid=(n, p_split, tiles_per_part),
        in_specs=[
            pl.BlockSpec((None, c, s_tile, 128),
                         lambda i, p, t: (i, 0, p * tiles_per_part + t, 0)),
            pl.BlockSpec((None, s_tile, 128),
                         lambda i, p, t: (i, p * tiles_per_part + t, 0)),
        ],
        out_specs=[
            pl.BlockSpec((None, 1, 1), lambda i, p, t: (i * p_split + p, 0, 0)),
            pl.BlockSpec((None, 1, 1), lambda i, p, t: (i * p_split + p, 0, 0)),
        ],
        out_shape=[
            jax.ShapeDtypeStruct((n * p_split, 1, 1), jnp.float32),
            jax.ShapeDtypeStruct((n * p_split, 1, 1), jnp.float32),
        ],
        scratch_shapes=[
            pltpu.VMEM((s_tile, 128), jnp.float32),
            pltpu.VMEM((s_tile, 128), jnp.float32),
        ],
        compiler_params=pltpu.CompilerParams(
            dimension_semantics=("parallel", "parallel", "arbitrary")),
    )(x4, tgt3)

    # Tiny scalar combine, reproducing the PyTorch (M,1,M) broadcasting quirk:
    #   mean -> -(mean_i alpha_t[i]) * (mean_j (1-pt_j)^g log pt_j)
    #   sum  -> -(sum_i  alpha_t[i]) * (sum_j  (1-pt_j)^g log pt_j)
    total_alpha = jnp.sum(sum_a)
    total_fl = jnp.sum(sum_fl)
    if size_average:
        m_f = jnp.float32(m)
        return -(total_alpha / m_f) * (total_fl / m_f)
    return -(total_alpha * total_fl)


def _focal_loss_reference(x, target, alpha, *, gamma=GAMMA, size_average=True):
    """Pure-JAX reference with the same (faithful-to-PyTorch) semantics."""
    a = jnp.asarray([float(v) for v in alpha], jnp.float32)
    a = a / jnp.sum(a)
    xf = x.astype(jnp.float32)
    x_max = jnp.max(xf, axis=1, keepdims=True)
    logp = xf - x_max - jnp.log(jnp.sum(jnp.exp(xf - x_max), axis=1, keepdims=True))
    tgt = target.astype(jnp.int32)
    logpt = jnp.take_along_axis(logp, tgt[:, None], axis=1)[:, 0]   # [N,H,W]
    pt = jnp.exp(logpt)
    fl = jnp.power(1.0 - pt, gamma) * logpt
    alpha_t = a[tgt]
    if size_average:
        return -(jnp.mean(alpha_t) * jnp.mean(fl))
    return -(jnp.sum(alpha_t) * jnp.sum(fl))


if __name__ == "__main__":
    key = jax.random.PRNGKey(0)
    k_x, k_t, k_x2, k_t2 = jax.random.split(key, 4)

    # Small shapes consistent with the module: 5 classes (len(alpha) == 5), NCHW logits.
    N, C, H, W = 2, NUM_CLASS, 16, 16
    x = jax.random.normal(k_x, (N, C, H, W), dtype=jnp.float32)
    target = jax.random.randint(k_t, (N, H, W), 0, C, dtype=jnp.int32)

    loss = focal_loss(x, target, ALPHA_LIST, gamma=GAMMA, size_average=True)
    jax.block_until_ready(loss)
    ref = _focal_loss_reference(x, target, ALPHA_LIST, gamma=GAMMA, size_average=True)
    assert jnp.allclose(loss, ref, rtol=1e-2, atol=1e-6), (loss, ref)

    # Ragged spatial size (hw not a multiple of 128) exercises the padded/masked tail
    # path and size_average=False.
    x2 = jax.random.normal(k_x2, (1, C, 9, 10), dtype=jnp.float32)
    t2 = jax.random.randint(k_t2, (1, 9, 10), 0, C, dtype=jnp.int32)
    loss2 = focal_loss(x2, t2, ALPHA_LIST, gamma=GAMMA, size_average=False)
    jax.block_until_ready(loss2)
    ref2 = _focal_loss_reference(x2, t2, ALPHA_LIST, gamma=GAMMA, size_average=False)
    assert jnp.allclose(loss2, ref2, rtol=1e-2, atol=1e-6), (loss2, ref2)

    print("KERNEL_OK")
</pallas_src>

<mosaic_0001>
module attributes {stable_mosaic.version = 11 : i64} {
  func.func @_focal_loss_kernel(%arg0: i32, %arg1: i32, %arg2: i32, %arg3: memref<1x5x2x128xf32, #tpu.memory_space<vmem>>, %arg4: memref<1x2x128xi8, #tpu.memory_space<vmem>>, %arg5: memref<1x1x1xf32, #tpu.memory_space<vmem>>, %arg6: memref<1x1x1xf32, #tpu.memory_space<vmem>>, %arg7: memref<2x128xf32, #tpu.memory_space<vmem>>, %arg8: memref<2x128xf32, #tpu.memory_space<vmem>>) attributes {dimension_semantics = [#tpu.dimension_semantics<parallel>, #tpu.dimension_semantics<parallel>, #tpu.dimension_semantics<arbitrary>], iteration_bounds = array<i64: 2, 1, 1>, scalar_prefetch = 0 : i64, scratch_operands = 2 : i64, tpu.core_type = #tpu.core_type<tc>, window_params = [{transform_indices = @transform_0, window_bounds = array<i64: 1, 5, 2, 128>}, {transform_indices = @transform_1, window_bounds = array<i64: 1, 2, 128>}, {transform_indices = @transform_2, window_bounds = array<i64: 1, 1, 1>}, {transform_indices = @transform_3, window_bounds = array<i64: 1, 1, 1>}]} {
    %c0_i32 = arith.constant 0 : i32
    %0 = arith.cmpi eq, %arg2, %c0_i32 : i32
    %1 = arith.extui %0 : i1 to i32
    %c0_i32_0 = arith.constant 0 : i32
    %2 = arith.cmpi ne, %1, %c0_i32_0 : i32
    scf.if %2 {
      %cst_58 = arith.constant 0.000000e+00 : f32
      %94 = vector.broadcast %cst_58 : f32 to vector<2x128xf32>
      %c0_59 = arith.constant 0 : index
      %c0_60 = arith.constant 0 : index
      %95 = vector.load %arg7[%c0_59, %c0_60] : memref<2x128xf32, #tpu.memory_space<vmem>>, vector<2x128xf32>
      tpu.vector_store %arg7[%c0_59, %c0_60], %94 {strides = array<i32>} : memref<2x128xf32, #tpu.memory_space<vmem>>, vector<2x128xf32>,
      %cst_61 = arith.constant 0.000000e+00 : f32
      %96 = vector.broadcast %cst_61 : f32 to vector<2x128xf32>
      %c0_62 = arith.constant 0 : index
      %c0_63 = arith.constant 0 : index
      %97 = vector.load %arg8[%c0_62, %c0_63] : memref<2x128xf32, #tpu.memory_space<vmem>>, vector<2x128xf32>
      tpu.vector_store %arg8[%c0_62, %c0_63], %96 {strides = array<i32>} : memref<2x128xf32, #tpu.memory_space<vmem>>, vector<2x128xf32>,
    } else {
    }
    %c0 = arith.constant 0 : index
    %c0_1 = arith.constant 0 : index
    %c0_2 = arith.constant 0 : index
    %3 = vector.load %arg4[%c0, %c0_1, %c0_2] : memref<1x2x128xi8, #tpu.memory_space<vmem>>, vector<1x2x128xi8>
    %4 = vector.shape_cast %3 : vector<1x2x128xi8> to vector<2x128xi8>
    %5 = arith.extsi %4 : vector<2x128xi8> to vector<2x128xi32>
    %c0_3 = arith.constant 0 : index
    %c0_4 = arith.constant 0 : index
    %c0_5 = arith.constant 0 : index
    %c0_6 = arith.constant 0 : index
    %6 = vector.load %arg3[%c0_3, %c0_4, %c0_5, %c0_6] : memref<1x5x2x128xf32, #tpu.memory_space<vmem>>, vector<1x1x2x128xf32>
    %7 = vector.shape_cast %6 : vector<1x1x2x128xf32> to vector<2x128xf32>
    %c0_7 = arith.constant 0 : index
    %c1 = arith.constant 1 : index
    %c0_8 = arith.constant 0 : index
    %c0_9 = arith.constant 0 : index
    %8 = vector.load %arg3[%c0_7, %c1, %c0_8, %c0_9] : memref<1x5x2x128xf32, #tpu.memory_space<vmem>>, vector<1x1x2x128xf32>
    %9 = vector.shape_cast %8 : vector<1x1x2x128xf32> to vector<2x128xf32>
    %10 = arith.maximumf %7, %9 : vector<2x128xf32>
    %c0_10 = arith.constant 0 : index
    %c2 = arith.constant 2 : index
    %c0_11 = arith.constant 0 : index
    %c0_12 = arith.constant 0 : index
    %11 = vector.load %arg3[%c0_10, %c2, %c0_11, %c0_12] : memref<1x5x2x128xf32, #tpu.memory_space<vmem>>, vector<1x1x2x128xf32>
    %12 = vector.shape_cast %11 : vector<1x1x2x128xf32> to vector<2x128xf32>
    %13 = arith.maximumf %10, %12 : vector<2x128xf32>
    %c0_13 = arith.constant 0 : index
    %c3 = arith.constant 3 : index
    %c0_14 = arith.constant 0 : index
    %c0_15 = arith.constant 0 : index
    %14 = vector.load %arg3[%c0_13, %c3, %c0_14, %c0_15] : memref<1x5x2x128xf32, #tpu.memory_space<vmem>>, vector<1x1x2x128xf32>
    %15 = vector.shape_cast %14 : vector<1x1x2x128xf32> to vector<2x128xf32>
    %16 = arith.maximumf %13, %15 : vector<2x128xf32>
    %c0_16 = arith.constant 0 : index
    %c4 = arith.constant 4 : index
    %c0_17 = arith.constant 0 : index
    %c0_18 = arith.constant 0 : index
    %17 = vector.load %arg3[%c0_16, %c4, %c0_17, %c0_18] : memref<1x5x2x128xf32, #tpu.memory_space<vmem>>, vector<1x1x2x128xf32>
    %18 = vector.shape_cast %17 : vector<1x1x2x128xf32> to vector<2x128xf32>
    %19 = arith.maximumf %16, %18 : vector<2x128xf32>
    %c0_19 = arith.constant 0 : index
    %c0_20 = arith.constant 0 : index
    %c0_21 = arith.constant 0 : index
    %c0_22 = arith.constant 0 : index
    %20 = vector.load %arg3[%c0_19, %c0_20, %c0_21, %c0_22] : memref<1x5x2x128xf32, #tpu.memory_space<vmem>>, vector<1x1x2x128xf32>
    %21 = vector.shape_cast %20 : vector<1x1x2x128xf32> to vector<2x128xf32>
    %22 = arith.subf %21, %19 : vector<2x128xf32>
    %23 = math.exp %22 : vector<2x128xf32>
    %c0_i32_23 = arith.constant 0 : i32
    %24 = vector.broadcast %c0_i32_23 : i32 to vector<2x128xi32>
    %25 = arith.cmpi eq, %5, %24 : vector<2x128xi32>
    %cst = arith.constant 0.000000e+00 : f32
    %26 = vector.broadcast %cst : f32 to vector<2x128xf32>
    %27 = arith.select %25, %23, %26 : vector<2x128xi1>, vector<2x128xf32>
    %cst_24 = arith.constant 0.000000e+00 : f32
    %28 = vector.broadcast %cst_24 : f32 to vector<2x128xf32>
    %29 = arith.select %25, %22, %28 : vector<2x128xi1>, vector<2x128xf32>
    %cst_25 = arith.constant 1.825000e-01 : f32
    %cst_26 = arith.constant 0.000000e+00 : f32
    %30 = vector.broadcast %cst_25 : f32 to vector<2x128xf32>
    %31 = vector.broadcast %cst_26 : f32 to vector<2x128xf32>
    %32 = arith.select %25, %30, %31 : vector<2x128xi1>, vector<2x128xf32>
    %c0_27 = arith.constant 0 : index
    %c1_28 = arith.constant 1 : index
    %c0_29 = arith.constant 0 : index
    %c0_30 = arith.constant 0 : index
    %33 = vector.load %arg3[%c0_27, %c1_28, %c0_29, %c0_30] : memref<1x5x2x128xf32, #tpu.memory_space<vmem>>, vector<1x1x2x128xf32>
    %34 = vector.shape_cast %33 : vector<1x1x2x128xf32> to vector<2x128xf32>
    %35 = arith.subf %34, %19 : vector<2x128xf32>
    %36 = math.exp %35 : vector<2x128xf32>
    %c1_i32 = arith.constant 1 : i32
    %37 = vector.broadcast %c1_i32 : i32 to vector<2x128xi32>
    %38 = arith.cmpi eq, %5, %37 : vector<2x128xi32>
    %39 = arith.addf %23, %36 : vector<2x128xf32>
    %40 = arith.select %38, %36, %27 : vector<2x128xi1>, vector<2x128xf32>
    %41 = arith.select %38, %35, %29 : vector<2x128xi1>, vector<2x128xf32>
    %cst_31 = arith.constant 1.500000e-01 : f32
    %42 = vector.broadcast %cst_31 : f32 to vector<2x128xf32>
    %43 = arith.select %38, %42, %32 : vector<2x128xi1>, vector<2x128xf32>
    %c0_32 = arith.constant 0 : index
    %c2_33 = arith.constant 2 : index
    %c0_34 = arith.constant 0 : index
    %c0_35 = arith.constant 0 : index
    %44 = vector.load %arg3[%c0_32, %c2_33, %c0_34, %c0_35] : memref<1x5x2x128xf32, #tpu.memory_space<vmem>>, vector<1x1x2x128xf32>
    %45 = vector.shape_cast %44 : vector<1x1x2x128xf32> to vector<2x128xf32>
    %46 = arith.subf %45, %19 : vector<2x128xf32>
    %47 = math.exp %46 : vector<2x128xf32>
    %c2_i32 = arith.constant 2 : i32
    %48 = vector.broadcast %c2_i32 : i32 to vector<2x128xi32>
    %49 = arith.cmpi eq, %5, %48 : vector<2x128xi32>
    %50 = arith.addf %39, %47 : vector<2x128xf32>
    %51 = arith.select %49, %47, %40 : vector<2x128xi1>, vector<2x128xf32>
    %52 = arith.select %49, %46, %41 : vector<2x128xi1>, vector<2x128xf32>
    %cst_36 = arith.constant 2.350000e-01 : f32
    %53 = vector.broadcast %cst_36 : f32 to vector<2x128xf32>
    %54 = arith.select %49, %53, %43 : vector<2x128xi1>, vector<2x128xf32>
    %c0_37 = arith.constant 0 : index
    %c3_38 = arith.constant 3 : index
    %c0_39 = arith.constant 0 : index
    %c0_40 = arith.constant 0 : index
    %55 = vector.load %arg3[%c0_37, %c3_38, %c0_39, %c0_40] : memref<1x5x2x128xf32, #tpu.memory_space<vmem>>, vector<1x1x2x128xf32>
    %56 = vector.shape_cast %55 : vector<1x1x2x128xf32> to vector<2x128xf32>
    %57 = arith.subf %56, %19 : vector<2x128xf32>
    %58 = math.exp %57 : vector<2x128xf32>
    %c3_i32 = arith.constant 3 : i32
    %59 = vector.broadcast %c3_i32 : i32 to vector<2x128xi32>
    %60 = arith.cmpi eq, %5, %59 : vector<2x128xi32>
    %61 = arith.addf %50, %58 : vector<2x128xf32>
    %62 = arith.select %60, %58, %51 : vector<2x128xi1>, vector<2x128xf32>
    %63 = arith.select %60, %57, %52 : vector<2x128xi1>, vector<2x128xf32>
    %cst_41 = arith.constant 2.375000e-01 : f32
    %64 = vector.broadcast %cst_41 : f32 to vector<2x128xf32>
    %65 = arith.select %60, %64, %54 : vector<2x128xi1>, vector<2x128xf32>
    %c0_42 = arith.constant 0 : index
    %c4_43 = arith.constant 4 : index
    %c0_44 = arith.constant 0 : index
    %c0_45 = arith.constant 0 : index
    %66 = vector.load %arg3[%c0_42, %c4_43, %c0_44, %c0_45] : memref<1x5x2x128xf32, #tpu.memory_space<vmem>>, vector<1x1x2x128xf32>
    %67 = vector.shape_cast %66 : vector<1x1x2x128xf32> to vector<2x128xf32>
    %68 = arith.subf %67, %19 : vector<2x128xf32>
    %69 = math.exp %68 : vector<2x128xf32>
    %c4_i32 = arith.constant 4 : i32
    %70 = vector.broadcast %c4_i32 : i32 to vector<2x128xi32>
    %71 = arith.cmpi eq, %5, %70 : vector<2x128xi32>
    %72 = arith.addf %61, %69 : vector<2x128xf32>
    %73 = arith.select %71, %69, %62 : vector<2x128xi1>, vector<2x128xf32>
    %74 = arith.select %71, %68, %63 : vector<2x128xi1>, vector<2x128xf32>
    %cst_46 = arith.constant 1.950000e-01 : f32
    %75 = vector.broadcast %cst_46 : f32 to vector<2x128xf32>
    %76 = arith.select %71, %75, %65 : vector<2x128xi1>, vector<2x128xf32>
    %77 = math.log %72 : vector<2x128xf32>
    %78 = arith.subf %74, %77 : vector<2x128xf32>
    %79 = tpu.reciprocal %72 {approx = true} : vector<2x128xf32> -> vector<2x128xf32>
    %80 = arith.mulf %73, %79 : vector<2x128xf32>
    %cst_47 = arith.constant 1.000000e+00 : f32
    %81 = vector.broadcast %cst_47 : f32 to vector<2x128xf32>
    %82 = arith.subf %81, %80 : vector<2x128xf32>
    %83 = arith.mulf %82, %82 : vector<2x128xf32>
    %84 = arith.mulf %83, %78 : vector<2x128xf32>
    %c0_48 = arith.constant 0 : index
    %c0_49 = arith.constant 0 : index
    %85 = vector.load %arg7[%c0_48, %c0_49] : memref<2x128xf32, #tpu.memory_space<vmem>>, vector<2x128xf32>
    %86 = arith.addf %85, %76 : vector<2x128xf32>
    %c0_50 = arith.constant 0 : index
    %c0_51 = arith.constant 0 : index
    %87 = vector.load %arg7[%c0_50, %c0_51] : memref<2x128xf32, #tpu.memory_space<vmem>>, vector<2x128xf32>
    tpu.vector_store %arg7[%c0_50, %c0_51], %86 {strides = array<i32>} : memref<2x128xf32, #tpu.memory_space<vmem>>, vector<2x128xf32>,
    %c0_52 = arith.constant 0 : index
    %c0_53 = arith.constant 0 : index
    %88 = vector.load %arg8[%c0_52, %c0_53] : memref<2x128xf32, #tpu.memory_space<vmem>>, vector<2x128xf32>
    %89 = arith.addf %88, %84 : vector<2x128xf32>
    %c0_54 = arith.constant 0 : index
    %c0_55 = arith.constant 0 : index
    %90 = vector.load %arg8[%c0_54, %c0_55] : memref<2x128xf32, #tpu.memory_space<vmem>>, vector<2x128xf32>
    tpu.vector_store %arg8[%c0_54, %c0_55], %89 {strides = array<i32>} : memref<2x128xf32, #tpu.memory_space<vmem>>, vector<2x128xf32>,
    %c0_i32_56 = arith.constant 0 : i32
    %91 = arith.cmpi eq, %arg2, %c0_i32_56 : i32
    %92 = arith.extui %91 : i1 to i32
    %c0_i32_57 = arith.constant 0 : i32
    %93 = arith.cmpi ne, %92, %c0_i32_57 : i32
    scf.if %93 {
      %c0_58 = arith.constant 0 : index
      %c0_59 = arith.constant 0 : index
      %94 = vector.load %arg7[%c0_58, %c0_59] : memref<2x128xf32, #tpu.memory_space<vmem>>, vector<2x128xf32>
      %95 = vector.shape_cast %94 : vector<2x128xf32> to vector<1x2x128xf32>
      %cst_60 = arith.constant dense<0.000000e+00> : vector<1xf32>
      %96 = vector.multi_reduction <add>, %95, %cst_60 [1, 2] : vector<1x2x128xf32> to vector<1xf32>
      %97 = vector.shape_cast %96 : vector<1xf32> to vector<1x1x1xf32>
      %98 = vector.extract %97[0, 0, 0] : f32 from vector<1x1x1xf32>
      %99 = vector.broadcast %98 : f32 to vector<1x1xf32>
      %c0_61 = arith.constant 0 : index
      %c0_62 = arith.constant 0 : index
      %c0_63 = arith.constant 0 : index
      %100 = vector.load %arg5[%c0_61, %c0_62, %c0_63] : memref<1x1x1xf32, #tpu.memory_space<vmem>>, vector<1x1x1xf32>
      %101 = vector.shape_cast %100 : vector<1x1x1xf32> to vector<1x1xf32>
      %102 = vector.shape_cast %99 : vector<1x1xf32> to vector<1x1x1xf32>
      tpu.vector_store %arg5[%c0_61, %c0_62, %c0_63], %102 {strides = array<i32>} : memref<1x1x1xf32, #tpu.memory_space<vmem>>, vector<1x1x1xf32>,
      %c0_64 = arith.constant 0 : index
      %c0_65 = arith.constant 0 : index
      %103 = vector.load %arg8[%c0_64, %c0_65] : memref<2x128xf32, #tpu.memory_space<vmem>>, vector<2x128xf32>
      %104 = vector.shape_cast %103 : vector<2x128xf32> to vector<1x2x128xf32>
      %cst_66 = arith.constant dense<0.000000e+00> : vector<1xf32>
      %105 = vector.multi_reduction <add>, %104, %cst_66 [1, 2] : vector<1x2x128xf32> to vector<1xf32>
      %106 = vector.shape_cast %105 : vector<1xf32> to vector<1x1x1xf32>
      %107 = vector.extract %106[0, 0, 0] : f32 from vector<1x1x1xf32>
      %108 = vector.broadcast %107 : f32 to vector<1x1xf32>
      %c0_67 = arith.constant 0 : index
      %c0_68 = arith.constant 0 : index
      %c0_69 = arith.constant 0 : index
      %109 = vector.load %arg6[%c0_67, %c0_68, %c0_69] : memref<1x1x1xf32, #tpu.memory_space<vmem>>, vector<1x1x1xf32>
      %110 = vector.shape_cast %109 : vector<1x1x1xf32> to vector<1x1xf32>
      %111 = vector.shape_cast %108 : vector<1x1xf32> to vector<1x1x1xf32>
      tpu.vector_store %arg6[%c0_67, %c0_68, %c0_69], %111 {strides = array<i32>} : memref<1x1x1xf32, #tpu.memory_space<vmem>>, vector<1x1x1xf32>,
    } else {
    }
    return
  }
  func.func @transform_0(%arg0: i32, %arg1: i32, %arg2: i32) -> (i32, i32, i32, i32) {
    %c1_i32 = arith.constant 1 : i32
    %0 = arith.muli %arg1, %c1_i32 : i32
    %1 = arith.addi %0, %arg2 : i32
    %c0_i32 = arith.constant 0 : i32
    %c0_i32_0 = arith.constant 0 : i32
    %c0_i32_1 = arith.constant 0 : i32
    return %arg0, %c0_i32, %1, %c0_i32_0 : i32, i32, i32, i32
  }
  func.func @transform_1(%arg0: i32, %arg1: i32, %arg2: i32) -> (i32, i32, i32) {
    %c1_i32 = arith.constant 1 : i32
    %0 = arith.muli %arg1, %c1_i32 : i32
    %1 = arith.addi %0, %arg2 : i32
    %c0_i32 = arith.constant 0 : i32
    %c0_i32_0 = arith.constant 0 : i32
    return %arg0, %1, %c0_i32 : i32, i32, i32
  }
  func.func @transform_2(%arg0: i32, %arg1: i32, %arg2: i32) -> (i32, i32, i32) {
    %c1_i32 = arith.constant 1 : i32
    %0 = arith.muli %arg0, %c1_i32 : i32
    %1 = arith.addi %0, %arg1 : i32
    %c0_i32 = arith.constant 0 : i32
    %c0_i32_0 = arith.constant 0 : i32
    %c0_i32_1 = arith.constant 0 : i32
    return %1, %c0_i32, %c0_i32_0 : i32, i32, i32
  }
  func.func @transform_3(%arg0: i32, %arg1: i32, %arg2: i32) -> (i32, i32, i32) {
    %c1_i32 = arith.constant 1 : i32
    %0 = arith.muli %arg0, %c1_i32 : i32
    %1 = arith.addi %0, %arg1 : i32
    %c0_i32 = arith.constant 0 : i32
    %c0_i32_0 = arith.constant 0 : i32
    %c0_i32_1 = arith.constant 0 : i32
    return %1, %c0_i32, %c0_i32_0 : i32, i32, i32
  }
}

</mosaic_0001>

<bundles_post_ra>
// kernel: tpu_custom_call.1
= control target key start
LH: loop header
LB: loop body
LE: loop exit
PB: predicated region body
PF: predicated region fallthrough
CT: control target
= control target key end

     0   :  { %9 = vsyncpa [#allocation5], 0  ;;  %s850_s0 = inlined_call_operand.hbm [shape: f32[2,5,2,128], index: 0, kind: input, shape index: {}]   ;;  %s851_s1 = inlined_call_operand.vmem [shape: s8[2,2,128], index: 1, kind: input, shape index: {}]   ;;  %s852_s2 = inlined_call_operand.vmem [shape: f32[2,1,1], index: 2, kind: output, shape index: {0}]   ;;  %s853_s3 = inlined_call_operand.vmem [shape: f32[2,1,1], index: 3, kind: output, shape index: {1}]  }
   0x1   :  { %11 = vsyncpa [#allocation5 + $0x1], 0  ;;  %s682_s12 = smov 0   ;;  %s684_s13 = smov 0  }
   0x2   :  { %s686_s14 = smov 0   ;;  %s688_s15 = smov 0  }
   0x3   :  { %s690_s16 = smov 0   ;;  %s692_s17 = smov 0  }
   0x4 LB: > { %s485_s18 = sadd.s32 4294967295, %s656_s17   ;;  %s36_s19 = sadd.s32 1, %s652_s16  ;;  %s656_s17 = sphi %s692_s17, %s17_s17   ;;  %s652_s16 = sphi %s690_s16, %s860_s16   ;;  %s648_s15 = sphi %s688_s15, %s859_s15   ;;  %s644_s14 = sphi %s686_s14, %s858_s14   ;;  %s640_s13 = sphi %s684_s13, %s857_s13   ;;  %s636_s12 = sphi %s682_s12, %s856_s12  }
   0x5   : > { %p38_p0 = scmp.ge.s32.totalorder %s36_s19, 2  ;;  %s47_s20 = sadd.s32 1, %s644_s14 }
   0x6   : > { %p54_p1 = scmp.ne.s32.totalorder %s644_s14, %s640_s13  ;;  %p55_p2 = scmp.eq.s32.totalorder %s656_s17, 0 }
   0x7   : > { %s862_s19 = smov (%p38_p0, %s36_s19), 0  ;;  %p60_p4 = scmp.ne.s32.totalorder %s640_s13, %s636_s12 }
   0x8   : > { %p56_p3 = por %p55_p2, %p54_p1  ;;  %s42_s21 = ssub.s32 %s652_s16, %s862_s19 }
   0x9   : > { %p61_p5 = scmp.eq.s32.totalorder %s485_s18, 0  ;;  %p45_p6 = scmp.eq.s32.totalorder %s42_s21, 0 }
   0xa   : > { %p510_p8 = scmp.lt.s32.totalorder %s656_s17, 2  ;;  %s170_s24 = sand.u32 1, %s644_s14  }
   0xb   : > { %p721_p7 = por %p61_p5, %p60_p4  ;;  %s498_s25 = smul.u32 160, %s652_s16 }
   0xc   : > { %s727_s23 = scalar_select %p45_p6, %s644_s14, %s47_s20  }
   0xd   : > { %s497_s26 = smul.u32 10, %s170_s24  ;;  %s734_s29 = scalar_lea.hbm %s850_s0, %s498_s25 }
   0xe   : > { %p736_p9 = pnand %p510_p8, %p56_p3  ;;  %s742_s6 = scalar_lea.sflag [#allocation5], %s170_s24 }
   0xf   : > { %s174_s4 = scalar_lea.vmem [#allocation4], %s497_s26  ;;  %s576_s7 = scalar_lea.hbm %s734_s29, 160 }
  0x10   : > { %s183_s5 = sshll.u32 %s174_s4, 4  ;;  %p577_p10 = scmp.ne.s32.totalorder %s734_s29, %s576_s7  ;;  %s740_s5 = int_to_ptr.vmem [resolvable:$true] %s183_s5 }
  0x11   : > { %p578_p11 = pneg %p736_p9  ;;  %s581_s10 = scalar_lea.hbm %s850_s0, 320 }
  0x12   : > { %p582_p0 = scmp.lt.u32.totalorder %s734_s29, %s850_s0  ;;  %p583_p1 = scmp.lt.u32.totalorder %s581_s10, %s576_s7 }
  0x13   : > { %p579_p12 = pnand %p578_p11, %p577_p10  ;;  %p585_p3 = scmp.lt.u32.totalorder %s576_s7, %s734_s29 }
  0x14   : > { %p584_p2 = por %p583_p1, %p582_p0 }
  0x15   : > { %p580_p13 = pneg %p579_p12 }
  0x16   : > { %p586_p4 = por %p585_p3, %p584_p2 }
  0x18   : > { %p587_p5 = pnand %p586_p4, %p580_p13 }
  0x1a   : > { %590 = shalt.err (!%p587_p5)
}
  0x1b   : > { %s591_s18 = scalar_lea.vmem %s740_s5, 160  ;;  %s658_s20 = smov [#allocation4]  }
  0x1c   : > { %p592_p6 = scmp.ne.s32.totalorder %s740_s5, %s591_s18  ;;  %s596_s21 = sshll.u32 %s658_s20, 4  ;;  %s597_s21 = int_to_ptr.vmem [resolvable:$false] %s596_s21 }
  0x1d   : > { %s598_s24 = scalar_lea.vmem %s597_s21, 320  ;;  %p599_p12 = scmp.lt.s32.totalorder %s740_s5, %s597_s21 }
  0x1e   : > { %p594_p8 = pnand %p592_p6, %p578_p11  ;;  %p600_p0 = scmp.lt.s32.totalorder %s598_s24, %s591_s18 }
  0x20   : > { %p595_p10 = pneg %p594_p8  ;;  %p601_p1 = por %p600_p0, %p599_p12 }
  0x22   : > { %p602_p2 = pnand %p601_p1, %p595_p10 }
  0x24   : > { %605 = shalt.err (!%p602_p2)
}
  0x25   : > { %s659_s25 = smov 32   ;;  %s660_s26 = smov 2  }
  0x26   : > { %509 = dma.hbm_to_vmem [thread:$0]  (!%p736_p9), %s734_s29, 160, %s740_s5, %s742_s6, %s659_s25, %s659_s25, %s660_s26  }
  0x27   : > { %p490_p11 = scmp.ge.s32.totalorder %s656_s17, 1  ;;  %p202_p13 = scmp.lt.s32.totalorder %s656_s17, 3 }
  0x29   : > { %p203_p3 = pnand %p490_p11, %p202_p13 }
  0x2a   : > { %s208_s27 = sand.u32 (!%p203_p3), 1, %s640_s13  }
  0x2b   : > { %206 = sbr.rel (%p203_p3) target bundleno = 322 (0x142), region = 28  ;;  %s209_s4 = scalar_lea.sflag (!%p203_p3), [#allocation5], %s208_s27 }
  0x2c   : > { %s499_s28 = smul.u32 (!%p203_p3), 10, %s208_s27 }
  0x2e   : > { %s212_s7 = scalar_lea.vmem (!%p203_p3), [#allocation4], %s499_s28 }
  0x32   : > { %631 = dma.done.wait (%p721_p7), %s209_s4, 160  }
  0x33   : > { %633 = vsyncadd (%p721_p7), %s209_s4, 4294967136  ;;  %p247_p4 = scmp.lt.s32.totalorder %s648_s15, 1  ;;  %v661_v0 = vmov 0.0   ;;  %v272_v2 = vld [vmem:[%s212_s7] sm:$0x3]  ;;  %vm342_vm5 = vcmask 1041408  }
  0x34   : > { %268 = vst [vmem:[#allocation2] sm:$0x3] %v661_v0  ;;  %269 = vst [vmem:[#allocation3] sm:$0x3] %v661_v0  ;;  %v491_v3 = vld [vmem:[%s212_s7 + $0x2] sm:$0x3] }
  0x35   : > { %s864_s15 = smov (!%p247_p4, %s648_s15), 1  ;;  %v275_v5 = vmax.f32 %v272_v2, %v491_v3  ;;  %v492_v6 = vld [vmem:[%s212_s7 + $0x4] sm:$0x3]  ;;  %v493_v7 = vld [vmem:[%s212_s7 + $0x6] sm:$0x3]  ;;  %vm354_vm6 = vcmask 0  }
  0x36   : > { %s252_s5 = scalar_lea.vmem %s851_s1, %s864_s15  ;;  %v494_v9 = vld [vmem:[%s212_s7 + $0x8] sm:$0x3]  ;;  %s257_s8 = scalar_lea.vmem %s852_s2, %s864_s15 }
  0x37   : > { %v270_v1 = vld [vmem:[%s252_s5] sm:$0x1]  ;;  %v278_v8 = vmax.f32 %v275_v5, %v492_v6  ;;  %s262_s12 = scalar_lea.vmem %s853_s3, %s864_s15 }
  0x38   : > { %v785_v4 = vunpack.c.0.s8 %v270_v1 }
  0x39   : > { %v281_v11 = vmax.f32 %v278_v8, %v493_v7 }
  0x3a   : > { %vm288_vm0 = vcmp.eq.s32.totalorder %v785_v4, 0  ;;  %vm295_vm1 = vcmp.eq.s32.totalorder %v785_v4, 1  ;;  %vm303_vm2 = vcmp.eq.s32.totalorder %v785_v4, 2  ;;  %vm311_vm3 = vcmp.eq.s32.totalorder %v785_v4, 3 }
  0x3b   : > { %v291_v10 = vsel %vm288_vm0, 0.1825, %v661_v0  ;;  %vm319_vm4 = vcmp.eq.s32.totalorder %v785_v4, 4  ;;  %v284_v14 = vmax.f32 %v281_v11, %v494_v9  ;;  %v332_v16 = vld [vmem:[#allocation2] sm:$0x3] }
  0x3c   : > { %v299_v12 = vsel %vm295_vm1, 0.15, %v291_v10  ;;  %v335_v57 = vld [vmem:[#allocation3] sm:$0x3] }
  0x3d   : > { %v307_v13 = vsel %vm303_vm2, 0.235, %v299_v12  ;;  %v285_v18 = vsub.f32 %v272_v2, %v284_v14  ;;  %v292_v19 = vsub.f32 %v491_v3, %v284_v14  ;;  %v300_v20 = vsub.f32 %v492_v6, %v284_v14 }
  0x3e   : > { %v315_v15 = vsel %vm311_vm3, 0.2375, %v307_v13  ;;  %v308_v21 = vsub.f32 %v493_v7, %v284_v14  ;;  %v316_v22 = vsub.f32 %v494_v9, %v284_v14 }
  0x3f   : > { %v323_v17 = vsel %vm319_vm4, 0.195, %v315_v15  ;;  %v286_v24 = vmul.f32 1.442695, %v285_v18  ;;  %v293_v25 = vmul.f32 1.442695, %v292_v19 }
  0x40   : > { %v333_v23 = vadd.f32 %v332_v16, %v323_v17  ;;  %v301_v26 = vmul.f32 1.442695, %v300_v20  ;;  %v309_v27 = vmul.f32 1.442695, %v308_v21  ;;  %v317_v28 = vmul.f32 1.442695, %v316_v22 }
  0x41   : > { %562 = vpow2.f32 %v286_v24  ;;  %v290_v41 = vsel %vm288_vm0, %v285_v18, 0.0 }
  0x42   : > { %334 = vst [vmem:[#allocation2] sm:$0x3] %v333_v23  ;;  %564 = vpow2.f32 %v293_v25  ;;  %v298_v43 = vsel %vm295_vm1, %v292_v19, %v290_v41 }
  0x43   : > { %566 = vpow2.f32 %v301_v26  ;;  %v306_v45 = vsel %vm303_vm2, %v300_v20, %v298_v43 }
  0x44   : > { %568 = vpow2.f32 %v309_v27  ;;  %v314_v47 = vsel %vm311_vm3, %v308_v21, %v306_v45 }
  0x45   : > { %570 = vpow2.f32 %v317_v28  ;;  %v322_v51 = vsel %vm319_vm4, %v316_v22, %v314_v47 }
  0x49   : > { %v341_v29 = vld [vmem:[#allocation2] sm:$0x3] }
  0x4a   : > { %v343_v30 = vsel %vm342_vm5, %v341_v29, 0.0 }
  0x4b   : > { %344 = vadd.xlane.f32.xlu0 %v343_v30  ;;  %v563_v31 = vpop.eup %562 }
  0x4c   : > { %v565_v32 = vpop.eup %564  ;;  %v289_v39 = vsel %vm288_vm0, %v563_v31, 0.0 }
  0x4d   : > { %v567_v33 = vpop.eup %566  ;;  %v296_v34 = vadd.f32 %v565_v32, %v563_v31  ;;  %v297_v42 = vsel %vm295_vm1, %v565_v32, %v289_v39 }
  0x4e   : > { %v569_v35 = vpop.eup %568  ;;  %v305_v44 = vsel %vm303_vm2, %v567_v33, %v297_v42 }
  0x4f   : > { %v304_v36 = vadd.f32 %v567_v33, %v296_v34  ;;  %v571_v37 = vpop.eup %570  ;;  %v313_v46 = vsel %vm311_vm3, %v569_v35, %v305_v44 }
  0x50   : > { %v321_v48 = vsel %vm319_vm4, %v571_v37, %v313_v46 }
  0x51   : > { %v312_v38 = vadd.f32 %v569_v35, %v304_v36 }
  0x53   : > { %v320_v40 = vadd.f32 %v571_v37, %v312_v38 }
  0x55   : > { %572 = vlog2.f32 %v320_v40 }
  0x56   : > { %574 = vrcp.f32 %v320_v40 }
  0x5f   : > { %v573_v49 = vpop.eup %572 }
  0x60   : > { %v575_v50 = vpop.eup %574  ;;  %v325_v52 = vmul.f32 0.6931472, %v573_v49 }
  0x61   : > { %v328_v53 = vmul.f32 %v575_v50, %v321_v48 }
  0x62   : > { %v326_v54 = vsub.f32 %v322_v51, %v325_v52 }
  0x63   : > { %v329_v55 = vsub.f32 1.0, %v328_v53 }
  0x65   : > { %v330_v56 = vmul.f32 %v329_v55, %v329_v55 }
  0x67   : > { %v331_v58 = vmul.f32 %v330_v56, %v326_v54 }
  0x69   : > { %v336_v59 = vadd.f32 %v335_v57, %v331_v58 }
  0x6b   : > { %337 = vst [vmem:[#allocation3] sm:$0x3] %v336_v59 }
  0x72   : > { %v356_v60 = vld [vmem:[#allocation3] sm:$0x3] }
  0x73   : > { %v357_v61 = vsel %vm342_vm5, %v356_v60, 0.0 }
  0x74   : > { %358 = vadd.xlane.f32.xlu0 %v357_v61 }
  0xd8   : > { %v345_v62 = vpop.xlane.xlu0 %344 }
  0xd9   : > { %v346_v63 = vrot.slane %v345_v62, 4 }
  0xdb   : > { %v347_v0 = vadd.f32 %v346_v63, %v345_v62 }
  0xdd   : > { %v348_v1 = vrot.slane %v347_v0, 2 }
  0xdf   : > { %v349_v2 = vadd.f32 %v348_v1, %v347_v0 }
  0xe1   : > { %v350_v3 = vrot.slane %v349_v2, 1 }
  0xe3   : > { %v351_v4 = vadd.f32 %v350_v3, %v349_v2 }
  0xe5   : > { %500 = vpush %v351_v4 }
 0x101   : > { %v359_v5 = vpop.xlane.xlu0 %358 }
 0x102   : > { %v360_v6 = vrot.slane %v359_v5, 4 }
 0x104   : > { %v361_v7 = vadd.f32 %v360_v6, %v359_v5 }
 0x106   : > { %v362_v8 = vrot.slane %v361_v7, 2 }
 0x108   : > { %v363_v9 = vadd.f32 %v362_v8, %v361_v7 }
 0x10a   : > { %v364_v10 = vrot.slane %v363_v9, 1 }
 0x10c   : > { %v365_v11 = vadd.f32 %v364_v10, %v363_v9 }
 0x10e   : > { %502 = vpush %v365_v11 }
 0x116   : > { %s501_s9 = spop %500 }
 0x117   : > { %v353_v12 = vstv %s501_s9 }
 0x118   : > { %355 = vst.msk [vmem:[%s257_s8] sm:$0x1] %vm354_vm6, %v353_v12 }
 0x13f   : > { %s503_s18 = spop %502 }
 0x140   : > { %v367_v13 = vstv %s503_s18 }
 0x141   : > { %368 = vst.msk [vmem:[%s262_s12] sm:$0x1] %vm354_vm6, %v367_v13 }
 0x142 PF: > { %s17_s17 = sadd.s32 1, %s656_s17   ;;  %s856_s12 = smov %s640_s13 }
 0x143   : > { %p14_p7 = scmp.ge.s32.totalorder %s17_s17, 4   ;;  %s857_s13 = smov %s644_s14 }
 0x144   : > { %s858_s14 = smov %s727_s23  ;;  %s859_s15 = smov %s652_s16 }
 0x145   : > { %s860_s16 = smov %s862_s19  ;;  %16 = sbr.rel (!%p14_p7) target bundleno = 4 (0x4), region = 95 }
 0x14c   :  { %404 = vsyncpa [#allocation5], 1 }
 0x14d   :  { %406 = vsyncpa [#allocation5 + $0x1], 1 }

</bundles_post_ra>
